<compile_context>
chip_gen: v7x
topology: tpu7x:2x2x1
jax: 0.10.0
libtpu: 0.0.40
codegen_flags: <defaults>
</compile_context>

<pallas_src>
import functools
import math

import numpy as np
import jax
import jax.numpy as jnp
from jax.experimental import pallas as pl
from jax.experimental.pallas import tpu as pltpu

LEAKY_SLOPE = 0.2      # GATConv default negative_slope
MASK_NEG = 1e30        # additive adjacency-mask magnitude


def _round_up(v, m):
    return (v + m - 1) // m * m


# ----------------------------------------------------------------------------- kernel
def _gat_kernel(x_ref, w_ref, bias_ref, maskb_ref, o_ref, *, src_col, dst_col):
    """One grid step processes `bt` samples.

    x_ref:    (bt, Np, Ip)  bf16     w_ref:     (Ip, Ope) bf16
    bias_ref: (1, Ope)      f32      maskb_ref: (Np, Np)  f32 additive mask
    o_ref:    (bt, Np, Ope) f32

    Columns `src_col` / `dst_col` of w_ref hold the folded attention
    projections W^T att_src / W^T att_dst, so per-node attention scores come
    out of the single MXU matmul as lane slices.
    """
    bt, np_, ip = x_ref.shape
    ope = w_ref.shape[1]

    # One MXU matmul for the whole block: (bt*Np, Ip) @ (Ip, Ope), f32 accum.
    x2 = x_ref[...].reshape(bt * np_, ip)
    h = jnp.dot(x2, w_ref[...], preferred_element_type=jnp.float32)
    bias = bias_ref[...]                                        # (1, Ope)

    # Pure-linear path (self-loop-only nodes): out = x W^T + bias.
    o_ref[...] = (h + bias).reshape(bt, np_, ope)

    # Only the very first sample of the whole batch owns the graph edges.
    @pl.when(pl.program_id(0) == 0)
    def _():
        h0 = h[:np_, :]                                         # sample 0: (Np, Ope)
        h0_t = jnp.transpose(h0)                                # (Ope, Np)
        a_src = h0_t[src_col:src_col + 1, :]                    # (1, Np)  source scores
        a_dst = h0[:, dst_col:dst_col + 1]                      # (Np, 1)  target scores
        # logits[i, j] = a_dst_i + a_src_j   (target i <- source j)
        logits = a_dst + a_src                                  # (Np, Np)
        logits = jnp.where(logits >= 0.0, logits, LEAKY_SLOPE * logits)
        logits = logits + maskb_ref[...]                        # additive adjacency mask
        m = jnp.max(logits, axis=-1, keepdims=True)
        e = jnp.exp(logits - m)
        p = e / jnp.sum(e, axis=-1, keepdims=True)              # exact denom (runs once/call)
        attn = jnp.dot(p.astype(jnp.bfloat16), h0.astype(jnp.bfloat16),
                       preferred_element_type=jnp.float32)      # (Np, Ope)
        o_ref[0] = attn + bias                                  # overwrite sample 0


# ----------------------------------------------------------------------------- host-side setup
def _adjacency_mask(positions, k):
    """EEG_GAT.topk_neighbor + GATConv add_self_loops as a dense (n, n) mask.

    mask[target, source] = 1 for every edge (source -> target) plus self-loops.
    """
    pos = np.asarray(positions, dtype=np.float64)
    n = pos.shape[0]
    dist = np.linalg.norm(pos[:, None, :] - pos[None, :, :], axis=-1)
    mask = np.zeros((n, n), dtype=np.float32)
    mask[np.arange(n), np.arange(n)] = 1.0                 # self-loops
    for i in range(n):
        nbrs = np.argsort(dist[i], kind="stable")[:k]      # matches python stable sorted()
        for j in nbrs:
            j = int(j)
            if j != i:
                mask[j, i] = 1.0                           # edge (source=i, target=j)
    return mask


def pack_params(w, att_src, att_dst, bias, positions, k=6):
    """Pack GATConv(in, out, heads=1) parameters into padded TPU buffers.

    w: (out, in)   att_src/att_dst/bias: (out,)   positions: (n, 3)
    """
    out_channels, in_channels = w.shape
    n = positions.shape[0]
    n_pad = _round_up(n, 8)
    i_pad = _round_up(in_channels, 128)
    o_pad = _round_up(out_channels + 2, 128)   # +2 spare lanes for folded att projections

    w = jnp.asarray(w, jnp.float32)
    a_s = jnp.asarray(att_src, jnp.float32)
    a_d = jnp.asarray(att_dst, jnp.float32)

    w_t = jnp.zeros((i_pad, o_pad), jnp.float32)
    w_t = w_t.at[:in_channels, :out_channels].set(w.T)
    # Fold attention projections into extra weight columns: a.(W x) == x.(W^T a).
    w_t = w_t.at[:in_channels, out_channels].set(w.T @ a_s)       # src column
    w_t = w_t.at[:in_channels, out_channels + 1].set(w.T @ a_d)   # dst column

    b_p = jnp.zeros((1, o_pad), jnp.float32).at[0, :out_channels].set(
        jnp.asarray(bias, jnp.float32))

    mask = np.zeros((n_pad, n_pad), dtype=np.float32)
    mask[np.arange(n_pad), np.arange(n_pad)] = 1.0                 # self-loops (incl. pad rows)
    mask[:n, :n] = np.maximum(mask[:n, :n], _adjacency_mask(positions, k))
    mask_bias = (mask - 1.0) * MASK_NEG                            # 0 on edges, -1e30 elsewhere

    return {
        "w_t": w_t.astype(jnp.bfloat16),                           # bf16 weights for the MXU
        "bias": b_p,
        "mask_bias": jnp.asarray(mask_bias, jnp.float32),
    }


# ----------------------------------------------------------------------------- forward
def eeg_gat_forward(x, params, out_channels, block_b=8):
    """x: (B, num_channels, num_features) -- same layout as the torch module input."""
    B, n, f_in = x.shape
    i_pad, o_pad = params["w_t"].shape
    n_pad = params["mask_bias"].shape[0]

    bt = max(1, min(block_b, B))               # samples per grid step
    b_pad = _round_up(B, bt)

    # One-time bf16 cast + pad to lane/sublane-aligned shapes (halves input HBM traffic).
    x_p = jnp.pad(x.astype(jnp.bfloat16),
                  ((0, b_pad - B), (0, n_pad - n), (0, i_pad - f_in)))

    flops = 2.0 * b_pad * n_pad * i_pad * o_pad + 4.0 * n_pad * n_pad * o_pad
    bytes_accessed = (x_p.size * 2 + b_pad * n_pad * o_pad * 4
                      + i_pad * o_pad * 2 + n_pad * n_pad * 4 + o_pad * 4)
    cost = pl.CostEstimate(flops=int(flops), transcendentals=int(n_pad * n_pad),
                           bytes_accessed=int(bytes_accessed))

    kernel = functools.partial(_gat_kernel,
                               src_col=out_channels, dst_col=out_channels + 1)

    out_p = pl.pallas_call(
        kernel,
        out_shape=jax.ShapeDtypeStruct((b_pad, n_pad, o_pad), jnp.float32),
        grid=(b_pad // bt,),
        in_specs=[
            pl.BlockSpec((bt, n_pad, i_pad), lambda b: (b, 0, 0)),
            # Grid-invariant operands: constant index maps -> DMA'd once.
            pl.BlockSpec((i_pad, o_pad), lambda b: (0, 0)),
            pl.BlockSpec((1, o_pad), lambda b: (0, 0)),
            pl.BlockSpec((n_pad, n_pad), lambda b: (0, 0)),
        ],
        out_specs=pl.BlockSpec((bt, n_pad, o_pad), lambda b: (b, 0, 0)),
        compiler_params=pltpu.CompilerParams(dimension_semantics=("parallel",)),
        cost_estimate=cost,
    )(x_p, params["w_t"], params["bias"], params["mask_bias"])

    # nn.Dropout(0.3): identity in inference mode (see TODO at top).
    return out_p[:B, :n, :out_channels]                            # (B, num_channels, out)


# ----------------------------------------------------------------------------- pure-JAX reference
def _reference(x, w, att_src, att_dst, bias, mask):
    """f32 reference of the torch flatten + single-sample-edge_index GATConv forward."""
    h = jnp.einsum("bnf,of->bno", x, w)                            # (B, n, out)
    out = h + bias[None, None, :]
    h0 = h[0]
    a_src = h0 @ att_src
    a_dst = h0 @ att_dst
    logits = a_dst[:, None] + a_src[None, :]
    logits = jnp.where(logits >= 0.0, logits, LEAKY_SLOPE * logits)
    logits = jnp.where(mask > 0.0, logits, -jnp.inf)
    p = jax.nn.softmax(logits, axis=-1)
    return out.at[0].set(p @ h0 + bias[None, :])


# ----------------------------------------------------------------------------- demo
if __name__ == "__main__":
    B = 2
    NUM_NODES = 16      # MEG channels / graph nodes (271 in the real model)
    IN_FEATS = 12       # GATConv in_channels  (244 real)
    OUT_FEATS = 12      # GATConv out_channels (244 real)
    K = 4               # k nearest neighbours (6 real)

    key = jax.random.PRNGKey(0)
    k_pos, k_w, k_s, k_d, k_x = jax.random.split(key, 5)
    positions = jax.random.normal(k_pos, (NUM_NODES, 3), jnp.float32)

    std_w = math.sqrt(2.0 / (IN_FEATS + OUT_FEATS))                # glorot-ish
    w = std_w * jax.random.normal(k_w, (OUT_FEATS, IN_FEATS), jnp.float32)
    std_a = math.sqrt(2.0 / (1 + OUT_FEATS))
    att_src = std_a * jax.random.normal(k_s, (OUT_FEATS,), jnp.float32)
    att_dst = std_a * jax.random.normal(k_d, (OUT_FEATS,), jnp.float32)
    bias = jnp.zeros((OUT_FEATS,), jnp.float32)                    # GATConv init: zeros

    params = pack_params(w, att_src, att_dst, bias, positions, k=K)
    x = jax.random.normal(k_x, (B, NUM_NODES, IN_FEATS), jnp.float32)

    fwd = jax.jit(eeg_gat_forward, static_argnames=("out_channels", "block_b"))
    out = jax.block_until_ready(fwd(x, params, out_channels=OUT_FEATS, block_b=8))

    assert out.shape == (B, NUM_NODES, OUT_FEATS), out.shape
    assert bool(jnp.all(jnp.isfinite(out)))

    ref = _reference(x, w, att_src, att_dst, bias,
                     jnp.asarray(_adjacency_mask(positions, K)))
    max_err = float(jnp.max(jnp.abs(out - ref)))
    assert max_err < 1e-1, f"max abs error vs f32 reference: {max_err}"
    print("KERNEL_OK")
</pallas_src>

<mosaic_0001>
module attributes {stable_mosaic.version = 11 : i64} {
  func.func @_gat_kernel(%arg0: i32, %arg1: memref<2x16x128xbf16, #tpu.memory_space<vmem>>, %arg2: memref<128x128xbf16, #tpu.memory_space<vmem>>, %arg3: memref<1x128xf32, #tpu.memory_space<vmem>>, %arg4: memref<16x16xf32, #tpu.memory_space<vmem>>, %arg5: memref<2x16x128xf32, #tpu.memory_space<vmem>>) attributes {dimension_semantics = [#tpu.dimension_semantics<parallel>], iteration_bounds = array<i64: 1>, scalar_prefetch = 0 : i64, scratch_operands = 0 : i64, tpu.core_type = #tpu.core_type<tc>, window_params = [{transform_indices = @transform_0, window_bounds = array<i64: 2, 16, 128>}, {pipeline_mode = #tpu.pipeline_mode<synchronous>, transform_indices = @transform_1, window_bounds = array<i64: 128, 128>}, {pipeline_mode = #tpu.pipeline_mode<synchronous>, transform_indices = @transform_2, window_bounds = array<i64: 1, 128>}, {pipeline_mode = #tpu.pipeline_mode<synchronous>, transform_indices = @transform_3, window_bounds = array<i64: 16, 16>}, {transform_indices = @transform_4, window_bounds = array<i64: 2, 16, 128>}]} {
    %c0 = arith.constant 0 : index
    %c0_0 = arith.constant 0 : index
    %c0_1 = arith.constant 0 : index
    %0 = vector.load %arg1[%c0, %c0_0, %c0_1] : memref<2x16x128xbf16, #tpu.memory_space<vmem>>, vector<2x16x128xbf16>
    %1 = vector.shape_cast %0 : vector<2x16x128xbf16> to vector<32x128xbf16>
    %c0_2 = arith.constant 0 : index
    %c0_3 = arith.constant 0 : index
    %2 = vector.load %arg2[%c0_2, %c0_3] : memref<128x128xbf16, #tpu.memory_space<vmem>>, vector<128x128xbf16>
    %cst = arith.constant dense<0.000000e+00> : vector<32x128xf32>
    %3 = tpu.matmul %1, %2, %cst {dimension_numbers = #tpu.dot_dimension_numbers<[1], [0], [0], [1], [0, 0, 1, 1], [], []>} : vector<32x128xbf16>, vector<128x128xbf16>, vector<32x128xf32> -> vector<32x128xf32>
    %c0_4 = arith.constant 0 : index
    %c0_5 = arith.constant 0 : index
    %4 = vector.load %arg3[%c0_4, %c0_5] : memref<1x128xf32, #tpu.memory_space<vmem>>, vector<1x128xf32>
    %5 = vector.broadcast %4 : vector<1x128xf32> to vector<32x128xf32>
    %6 = arith.addf %3, %5 : vector<32x128xf32>
    %7 = vector.shape_cast %6 : vector<32x128xf32> to vector<2x16x128xf32>
    %c0_6 = arith.constant 0 : index
    %c0_7 = arith.constant 0 : index
    %c0_8 = arith.constant 0 : index
    %8 = vector.load %arg5[%c0_6, %c0_7, %c0_8] : memref<2x16x128xf32, #tpu.memory_space<vmem>>, vector<2x16x128xf32>
    tpu.vector_store %arg5[%c0_6, %c0_7, %c0_8], %7 {strides = array<i32>} : memref<2x16x128xf32, #tpu.memory_space<vmem>>, vector<2x16x128xf32>,
    %c0_i32 = arith.constant 0 : i32
    %9 = arith.cmpi eq, %arg0, %c0_i32 : i32
    %10 = arith.extui %9 : i1 to i32
    %c0_i32_9 = arith.constant 0 : i32
    %11 = arith.cmpi ne, %10, %c0_i32_9 : i32
    scf.if %11 {
      %12 = vector.extract_strided_slice %3 {offsets = [0, 0], sizes = [16, 128], strides = [1, 1]} : vector<32x128xf32> to vector<16x128xf32>
      %13 = tpu.transpose %12, [1, 0] : vector<16x128xf32> -> vector<128x16xf32>
      %14 = vector.extract_strided_slice %13 {offsets = [12, 0], sizes = [1, 16], strides = [1, 1]} : vector<128x16xf32> to vector<1x16xf32>
      %15 = vector.extract_strided_slice %12 {offsets = [0, 13], sizes = [16, 1], strides = [1, 1]} : vector<16x128xf32> to vector<16x1xf32>
      %16 = vector.broadcast %15 : vector<16x1xf32> to vector<16x16xf32>
      %17 = vector.broadcast %14 : vector<1x16xf32> to vector<16x16xf32>
      %18 = arith.addf %16, %17 : vector<16x16xf32>
      %cst_10 = arith.constant 0.000000e+00 : f32
      %19 = vector.broadcast %cst_10 : f32 to vector<16x16xf32>
      %20 = arith.cmpf oge, %18, %19 : vector<16x16xf32>
      %cst_11 = arith.constant 2.000000e-01 : f32
      %21 = vector.broadcast %cst_11 : f32 to vector<16x16xf32>
      %22 = arith.mulf %21, %18 : vector<16x16xf32>
      %23 = arith.select %20, %18, %22 : vector<16x16xi1>, vector<16x16xf32>
      %c0_12 = arith.constant 0 : index
      %c0_13 = arith.constant 0 : index
      %24 = vector.load %arg4[%c0_12, %c0_13] : memref<16x16xf32, #tpu.memory_space<vmem>>, vector<16x16xf32>
      %25 = arith.addf %23, %24 : vector<16x16xf32>
      %cst_14 = arith.constant dense<0xFF800000> : vector<16xf32>
      %26 = vector.multi_reduction <maximumf>, %25, %cst_14 [1] : vector<16x16xf32> to vector<16xf32>
      %27 = vector.shape_cast %26 : vector<16xf32> to vector<16x1xf32>
      %28 = vector.broadcast %27 : vector<16x1xf32> to vector<16x16xf32>
      %29 = arith.subf %25, %28 : vector<16x16xf32>
      %30 = math.exp %29 : vector<16x16xf32>
      %cst_15 = arith.constant dense<0.000000e+00> : vector<16xf32>
      %31 = vector.multi_reduction <add>, %30, %cst_15 [1] : vector<16x16xf32> to vector<16xf32>
      %32 = vector.shape_cast %31 : vector<16xf32> to vector<16x1xf32>
      %33 = vector.broadcast %32 : vector<16x1xf32> to vector<16x16xf32>
      %34 = arith.divf %30, %33 : vector<16x16xf32>
      %35 = arith.truncf %34 : vector<16x16xf32> to vector<16x16xbf16>
      %36 = arith.truncf %12 : vector<16x128xf32> to vector<16x128xbf16>
      %cst_16 = arith.constant dense<0.000000e+00> : vector<16x128xf32>
      %37 = tpu.matmul %35, %36, %cst_16 {dimension_numbers = #tpu.dot_dimension_numbers<[1], [0], [0], [1], [0, 0, 1, 1], [], []>} : vector<16x16xbf16>, vector<16x128xbf16>, vector<16x128xf32> -> vector<16x128xf32>
      %38 = vector.broadcast %4 : vector<1x128xf32> to vector<16x128xf32>
      %39 = arith.addf %37, %38 : vector<16x128xf32>
      %c0_17 = arith.constant 0 : index
      %c0_18 = arith.constant 0 : index
      %c0_19 = arith.constant 0 : index
      %40 = vector.load %arg5[%c0_17, %c0_18, %c0_19] : memref<2x16x128xf32, #tpu.memory_space<vmem>>, vector<1x16x128xf32>
      %41 = vector.shape_cast %40 : vector<1x16x128xf32> to vector<16x128xf32>
      %42 = vector.shape_cast %39 : vector<16x128xf32> to vector<1x16x128xf32>
      tpu.vector_store %arg5[%c0_17, %c0_18, %c0_19], %42 {strides = array<i32>} : memref<2x16x128xf32, #tpu.memory_space<vmem>>, vector<1x16x128xf32>,
    } else {
    }
    return
  }
  func.func @transform_0(%arg0: i32) -> (i32, i32, i32) {
    %c0_i32 = arith.constant 0 : i32
    %c0_i32_0 = arith.constant 0 : i32
    %c0_i32_1 = arith.constant 0 : i32
    return %arg0, %c0_i32, %c0_i32_0 : i32, i32, i32
  }
  func.func @transform_1(%arg0: i32) -> (i32, i32) {
    %c0_i32 = arith.constant 0 : i32
    %c0_i32_0 = arith.constant 0 : i32
    %c0_i32_1 = arith.constant 0 : i32
    return %c0_i32, %c0_i32_0 : i32, i32
  }
  func.func @transform_2(%arg0: i32) -> (i32, i32) {
    %c0_i32 = arith.constant 0 : i32
    %c0_i32_0 = arith.constant 0 : i32
    %c0_i32_1 = arith.constant 0 : i32
    return %c0_i32, %c0_i32_0 : i32, i32
  }
  func.func @transform_3(%arg0: i32) -> (i32, i32) {
    %c0_i32 = arith.constant 0 : i32
    %c0_i32_0 = arith.constant 0 : i32
    %c0_i32_1 = arith.constant 0 : i32
    return %c0_i32, %c0_i32_0 : i32, i32
  }
  func.func @transform_4(%arg0: i32) -> (i32, i32, i32) {
    %c0_i32 = arith.constant 0 : i32
    %c0_i32_0 = arith.constant 0 : i32
    %c0_i32_1 = arith.constant 0 : i32
    return %arg0, %c0_i32, %c0_i32_0 : i32, i32, i32
  }
}

</mosaic_0001>

<bundles_post_ra>
// kernel: eeg_gat_forward.1
= control target key start
LH: loop header
LB: loop body
LE: loop exit
PB: predicated region body
PF: predicated region fallthrough
CT: control target
= control target key end

     0   :  { %v371_v10 = vmov 13   ;;  %v372_v11 = vmov 0.0   ;;  %v208_v20 = vlaneseq  ;;  %vm224_vm2 = vcmask 130048   ;;  %s461_s1 = inlined_call_operand.vmem [shape: bf16[128,128], index: 1, kind: input, shape index: {}]   ;;  %s462_s0 = inlined_call_operand.vmem [shape: bf16[2,16,128], index: 0, kind: input, shape index: {}]   ;;  %s463_s2 = inlined_call_operand.vmem [shape: f32[1,128], index: 2, kind: input, shape index: {}]   ;;  %s464_s4 = inlined_call_operand.vmem [shape: f32[2,16,128], index: 4, kind: output, shape index: {}]   ;;  %s465_s3 = inlined_call_operand.vmem [shape: f32[16,16], index: 3, kind: input, shape index: {}]  }
   0x1   :  { %v353_v0 = vld [vmem:[%s461_s1] sm:$0xff]   ;;  %v354_v1 = vld [vmem:[%s461_s1 + $0x8] sm:$0xff]   ;;  %v355_v2 = vld [vmem:[%s461_s1 + $0x10] sm:$0xff]   ;;  %352 = vset.pattern.permute.xlu0 %v371_v10  ;;  %343 = vmatprep.subr.bf16.mxu1 %v372_v11  ;;  %vm373_vm3 = vmmov 0  }
   0x2   :  { %323 = vmatprep.subr.bf16.mxu0 %v353_v0  ;;  %v356_v3 = vld [vmem:[%s461_s1 + $0x18] sm:$0xff]   ;;  %v361_v4 = vld [vmem:[%s462_s0] sm:$0xff]   ;;  %v358_v6 = vld [vmem:[%s461_s1 + $0x28] sm:$0xff]   ;;  %v209_v21 = vshrl.u32 %v208_v20, 7  ;;  %345 = vmatprep.mubr.msk.bf16.mxu1 %vm373_vm3, %v372_v11 }
   0x3   :  { %324 = vmatpush3.bf16.msra.mxu0 %v353_v0  ;;  %339 = vmatprep.mubr.bf16.mxu0 %v361_v4  ;;  %v357_v5 = vld [vmem:[%s461_s1 + $0x20] sm:$0xff]   ;;  %v359_v7 = vld [vmem:[%s461_s1 + $0x30] sm:$0xff]   ;;  %v360_v8 = vld [vmem:[%s461_s1 + $0x38] sm:$0xff]  }
   0x4   :  { %325 = vmatprep.subr.bf16.mxu0 %v354_v1  ;;  %v362_v9 = vld [vmem:[%s462_s0 + $0x8] sm:$0xff]   ;;  %v432_v12 = vld [vmem:[%s463_s2] ss:$0 sm:$0xff]  ;;  %v210_v24 = vsub.s32 4, %v209_v21 }
   0x5   :  { %v220_v30 = vld [vmem:[%s465_s3] sm:$0xff]  ;;  %v221_v31 = vld [vmem:[%s465_s3 + $0x8] sm:$0xff] }
   0x7   :  { %326 = vmatpush3.bf16.msra.mxu0 %v354_v1 }
   0x8   :  { %327 = vmatprep.subr.bf16.mxu0 %v355_v2 }
   0xb   :  { %328 = vmatpush3.bf16.msra.mxu0 %v355_v2 }
   0xc   :  { %329 = vmatprep.subr.bf16.mxu0 %v356_v3 }
   0xf   :  { %330 = vmatpush3.bf16.msra.mxu0 %v356_v3 }
  0x10   :  { %331 = vmatprep.subr.bf16.mxu0 %v357_v5 }
  0x13   :  { %332 = vmatpush3.bf16.msra.mxu0 %v357_v5 }
  0x14   :  { %333 = vmatprep.subr.bf16.mxu0 %v358_v6 }
  0x17   :  { %334 = vmatpush3.bf16.msra.mxu0 %v358_v6 }
  0x18   :  { %335 = vmatprep.subr.bf16.mxu0 %v359_v7 }
  0x1b   :  { %336 = vmatpush3.bf16.msra.mxu0 %v359_v7 }
  0x1c   :  { %337 = vmatprep.subr.bf16.mxu0 %v360_v8 }
  0x1f   :  { %338 = vmatpush3.bf16.msra.mxu0 %v360_v8 }
  0x22   :  { %340 = vmatmul.mubr.bf16.vlgmr.msra.gmra.mrb[0].mxu0 %v362_v9 }
  0xf5   :  { %v341_v13 = vpop.f32.mrb[0].mxu0 }
  0xf6   :  { %v156_v14 = vadd.f32 %v341_v13, %v432_v12  ;;  %v132_v15 = vpop.f32.mrb[1].mxu0 }
  0xf7   :  { %166 = vxpose.xlu1.b32.start [1/2] (short) (narrow) %v132_v15, 16  ;;  %200 = vperm.xlu0 %352, %v132_v15   ;;  %v342_v16 = vpop.f32.mrb[2].mxu0 }
  0xf8   :  { %160 = vst [vmem:[%s464_s4 + $0x10] sm:$0xff] %v156_v14  ;;  %v157_v17 = vadd.f32 %v342_v16, %v432_v12  ;;  %v135_v18 = vpop.f32.mrb[3].mxu0 }
  0xf9   :  { %v248_v19 = vpack.c.bf16 %v135_v18, %v132_v15 }
  0xfa   :  { %161 = vst [vmem:[%s464_s4 + $0x18] sm:$0xff] %v157_v17 }
  0xfb   :  { %167 = vxpose.xlu1.b32.end [2/2] (short) (narrow) %v135_v18, 16  ;;  %205 = vperm.xlu0 %352, %v135_v18  }
  0xfc   :  { %344 = vmatpush3.bf16.msra.mxu1 %v248_v19 }
 0x176   :  { %v201_v22 = vpop.permute.xlu0 %200 }
 0x177   :  { %v182_v23 = vpop.trf.xlu1 }
 0x17a   :  { %v206_v27 = vpop.permute.xlu0 %205 }
 0x17b   :  { %v183_v25 = vpop.trf.xlu1 }
 0x17c   :  { %v211_v26 = vrot.slane %v183_v25, %v210_v24 }
 0x17e   :  { %v212_v28 = vadd.f32 %v211_v26, %v201_v22  ;;  %v213_v29 = vadd.f32 %v211_v26, %v206_v27 }
 0x180   :  { %v216_v32 = vmul.f32 0.2, %v212_v28  ;;  %v217_v33 = vmul.f32 0.2, %v213_v29  ;;  %vm214_vm0 = vcmp.ge.f32.partialorder %v212_v28, 0.0  ;;  %vm215_vm1 = vcmp.ge.f32.partialorder %v213_v29, 0.0 }
 0x182   :  { %v218_v34 = vsel %vm214_vm0, %v212_v28, %v216_v32  ;;  %v219_v35 = vsel %vm215_vm1, %v213_v29, %v217_v33 }
 0x183   :  { %v222_v36 = vadd.f32 %v220_v30, %v218_v34  ;;  %v223_v37 = vadd.f32 %v221_v31, %v219_v35 }
 0x185   :  { %v225_v38 = vsel %vm224_vm2, %v222_v36, -inf  ;;  %v228_v39 = vsel %vm224_vm2, %v223_v37, -inf }
 0x186   :  { %226 = vmax.xlane.f32.xlu0 %v225_v38  ;;  %229 = vmax.xlane.f32.xlu1 %v228_v39 }
 0x213   :  { %v230_v40 = vpop.xlane.xlu1 %229  ;;  %v227_v41 = vpop.xlane.xlu0 %226 }
 0x214   :  { %v232_v42 = vsub.f32 %v223_v37, %v230_v40  ;;  %v231_v43 = vsub.f32 %v222_v36, %v227_v41 }
 0x216   :  { %v233_v44 = vmul.f32 1.442695, %v231_v43  ;;  %v235_v45 = vmul.f32 1.442695, %v232_v42 }
 0x218   :  { %363 = vpow2.f32 %v233_v44 }
 0x219   :  { %365 = vpow2.f32 %v235_v45 }
 0x222   :  { %v364_v46 = vpop.eup %363 }
 0x223   :  { %v237_v47 = vsel %vm224_vm2, %v364_v46, 0.0  ;;  %v366_v48 = vpop.eup %365 }
 0x224   :  { %238 = vadd.xlane.f32.xlu0 %v237_v47  ;;  %v240_v49 = vsel %vm224_vm2, %v366_v48, 0.0 }
 0x228   :  { %241 = vadd.xlane.f32.xlu0 %v240_v49 }
 0x2b1   :  { %v239_v50 = vpop.xlane.xlu0 %238 }
 0x2b2   :  { %367 = vrcp.f32 %v239_v50 }
 0x2b5   :  { %v242_v51 = vpop.xlane.xlu0 %241 }
 0x2b6   :  { %369 = vrcp.f32 %v242_v51 }
 0x2bc   :  { %v368_v52 = vpop.eup %367 }
 0x2bd   :  { %v244_v54 = vmul.f32 %v368_v52, %v364_v46 }
 0x2c0   :  { %v370_v53 = vpop.eup %369 }
 0x2c1   :  { %v246_v55 = vmul.f32 %v370_v53, %v366_v48 }
 0x2c3   :  { %v247_v56 = vpack.c.bf16 %v246_v55, %v244_v54 }
 0x2c5   :  { %346 = vmatmul.mubr.msk.bf16.vlgmr.msra.gmra.mrb[0].mxu1 %vm224_vm2, %v247_v56 }
 0x398   :  { %v286_v57 = vpop.f32.mrb[0].mxu1 }
 0x399   :  { %v287_v58 = vadd.f32 %v432_v12, %v286_v57  ;;  %v347_v59 = vpop.f32.mrb[1].mxu1 }
 0x39a   :  { %v289_v60 = vpop.f32.mrb[2].mxu1 }
 0x39b   :  { %293 = vst [vmem:[%s464_s4] sm:$0xff] %v287_v58  ;;  %v290_v61 = vadd.f32 %v432_v12, %v289_v60  ;;  %v348_v62 = vpop.f32.mrb[3].mxu1 }
 0x39d   :  { %294 = vst [vmem:[%s464_s4 + $0x8] sm:$0xff] %v290_v61 }

</bundles_post_ra>
